<compile_context>
chip_gen: v6e
topology: v6e:2x2x1
jax: 0.10.0
libtpu: 0.0.40
codegen_flags: <defaults>
</compile_context>

<pallas_src>
import functools
import math

import jax
import jax.numpy as jnp
from jax import lax
from jax.experimental import pallas as pl
from jax.experimental.pallas import tpu as pltpu

_LN_EPS = 1e-5
_VMEM_LIMIT = 40 * 1024 * 1024      # per stacked-layer kernel; safe on v5e/v6e/v7x


# ---------------------------------------------------------------------------
# Shared math helpers (used identically inside the Pallas kernels and in the
# pure-JAX parity reference, so kernel-vs-reference differences come only from
# execution, not from the math).
# ---------------------------------------------------------------------------
def _ln_f32(x, g, b, eps):
    mu = jnp.mean(x, axis=-1, keepdims=True)
    var = jnp.mean(jnp.square(x - mu), axis=-1, keepdims=True)
    return (x - mu) * lax.rsqrt(var + eps) * g + b


def _mm_bf16(x, w, b):
    # bf16 MXU operands, f32 accumulate + f32 bias epilogue.
    return jnp.dot(x.astype(jnp.bfloat16), w, preferred_element_type=jnp.float32) + b


def _block_diag_bias(mq, mk, per_q, per_k):
    # Additive attention bias: 0 where query-row and key-row belong to the same batch
    # element, -1e30 otherwise (prevents cross-batch attention on the flat slab).
    rb = lax.broadcasted_iota(jnp.int32, (mq, mk), 0) // per_q
    cb = lax.broadcasted_iota(jnp.int32, (mq, mk), 1) // per_k
    return jnp.where(rb == cb, 0.0, -1e30).astype(jnp.float32)


def _head_attn(q, k, v, bias):
    # q (Mq, Dh) f32, k/v (Mk, Dh) f32, bias (Mq, Mk) f32 additive -> (Mq, Dh) f32.
    s = lax.dot_general(q.astype(jnp.bfloat16), k.astype(jnp.bfloat16),
                        (((1,), (1,)), ((), ())),
                        preferred_element_type=jnp.float32) + bias
    p = jnp.exp(s - jnp.max(s, axis=-1, keepdims=True))
    p = p / jnp.sum(p, axis=-1, keepdims=True)
    return jnp.dot(p.astype(jnp.bfloat16), v.astype(jnp.bfloat16),
                   preferred_element_type=jnp.float32)


def _nbytes(a):
    return int(a.size) * a.dtype.itemsize


# ---------------------------------------------------------------------------
# Small single-step kernels (fc / final projection / linear mode)
# ---------------------------------------------------------------------------
def _linear_kernel(x_ref, w_ref, b_ref, o_ref):
    o_ref[...] = _mm_bf16(x_ref[...], w_ref[...], b_ref[...]).astype(o_ref.dtype)


def _add_linear_kernel(x_ref, e_ref, w_ref, b_ref, o_ref):
    o_ref[...] = _mm_bf16(x_ref[...] + e_ref[...], w_ref[...],
                          b_ref[...]).astype(o_ref.dtype)


def _ln_linear_kernel(x_ref, g_ref, bt_ref, w_ref, b_ref, o_ref, *, eps):
    xn = _ln_f32(x_ref[...], g_ref[...], bt_ref[...], eps)
    o_ref[...] = _mm_bf16(xn, w_ref[...], b_ref[...]).astype(o_ref.dtype)


def _single_step_call(kernel, args, out_shape_2d, cost):
    # grid=(1,): no N split (review: the split only duplicated the LN prologue and paid
    # per-step pipeline overhead on 1-TC chips; negligible upside on v7x at M<=16).
    in_specs = [pl.BlockSpec(a.shape, lambda i: (0, 0)) for a in args]
    return pl.pallas_call(
        kernel,
        out_shape=jax.ShapeDtypeStruct(out_shape_2d, jnp.float32),
        grid_spec=pltpu.PrefetchScalarGridSpec(
            num_scalar_prefetch=0, grid=(1,),
            in_specs=in_specs,
            out_specs=pl.BlockSpec(out_shape_2d, lambda i: (0, 0))),
        compiler_params=pltpu.CompilerParams(dimension_semantics=("arbitrary",)),
        cost_estimate=cost,
    )(*args)


def linear_pallas(x, w, b):
    M, K = x.shape
    N = w.shape[1]
    cost = pl.CostEstimate(flops=2 * M * K * N, transcendentals=0,
                           bytes_accessed=M * K * 4 + K * N * 2 + M * N * 4)
    return _single_step_call(_linear_kernel, (x, w, b), (M, N), cost)


def add_linear_pallas(x, e, w, b):
    M, K = x.shape
    N = w.shape[1]
    cost = pl.CostEstimate(flops=2 * M * K * N + M * K, transcendentals=0,
                           bytes_accessed=2 * M * K * 4 + K * N * 2 + M * N * 4)
    return _single_step_call(_add_linear_kernel, (x, e, w, b), (M, N), cost)


def ln_linear_pallas(x, g, bt, w, b):
    M, K = x.shape
    N = w.shape[1]
    cost = pl.CostEstimate(flops=2 * M * K * N + 8 * M * K, transcendentals=0,
                           bytes_accessed=M * K * 4 + K * N * 2 + M * N * 4)
    return _single_step_call(functools.partial(_ln_linear_kernel, eps=_LN_EPS),
                             (x, g, bt, w, b), (M, N), cost)


# ---------------------------------------------------------------------------
# Fused encoder stack: one pallas_call, grid = (num_layers,), weights streamed.
# ---------------------------------------------------------------------------
def _enc_stack_kernel(x_ref, wqkv_ref, bqkv_ref, wo_ref, bo_ref,
                      w1_ref, b1_ref, w2_ref, b2_ref,
                      g1_ref, n1_ref, g2_ref, n2_ref, ng_ref, nb_ref,
                      out_ref, res_ref, att_ref, *, B, L, H, Dh, eps):
    lyr = pl.program_id(0)
    last = pl.num_programs(0) - 1
    E = H * Dh
    M = B * L

    @pl.when(lyr == 0)
    def _():
        res_ref[...] = x_ref[...]            # residual carry lives in VMEM scratch

    x = res_ref[...]
    bias = _block_diag_bias(M, M, L, L)

    # --- self-attention sub-layer (pre-norm); Q scale folded into Wqkv at init ---
    xn = _ln_f32(x, g1_ref[0], n1_ref[0], eps)
    qkv = _mm_bf16(xn, wqkv_ref[0], bqkv_ref[0])               # (M, 3E) f32
    qp, kp, vp = qkv[:, :E], qkv[:, E:2 * E], qkv[:, 2 * E:]
    for h in range(H):
        c = slice(h * Dh, (h + 1) * Dh)
        att_ref[:, c] = _head_attn(qp[:, c], kp[:, c], vp[:, c], bias)
    x = x + _mm_bf16(att_ref[...], wo_ref[0], bo_ref[0])

    # --- feed-forward sub-layer (pre-norm); (M, dff) intermediate never leaves VMEM ---
    xn = _ln_f32(x, g2_ref[0], n2_ref[0], eps)
    ff = jnp.maximum(_mm_bf16(xn, w1_ref[0], b1_ref[0]), 0.0)
    x = x + _mm_bf16(ff, w2_ref[0], b2_ref[0])

    res_ref[...] = x
    out_ref[...] = x.astype(out_ref.dtype)

    @pl.when(lyr == last)
    def _():
        # encoder's final LayerNorm -> kernel directly emits the decoder memory tensor
        out_ref[...] = _ln_f32(x, ng_ref[...], nb_ref[...], eps).astype(out_ref.dtype)


def encoder_stack_pallas(x, enc, enc_norm, *, B, L, H, eps=_LN_EPS):
    M, E = x.shape
    nl = enc['wqkv'].shape[0]
    dff = enc['w1'].shape[-1]
    Dh = E // H
    lyr = lambda l: (l, 0, 0)
    cst = lambda l: (0, 0)
    in_specs = [
        pl.BlockSpec((M, E), cst),                                     # x (resident)
        pl.BlockSpec((1, E, 3 * E), lyr), pl.BlockSpec((1, 1, 3 * E), lyr),   # wqkv/bqkv
        pl.BlockSpec((1, E, E), lyr), pl.BlockSpec((1, 1, E), lyr),           # wo/bo
        pl.BlockSpec((1, E, dff), lyr), pl.BlockSpec((1, 1, dff), lyr),       # w1/b1
        pl.BlockSpec((1, dff, E), lyr), pl.BlockSpec((1, 1, E), lyr),         # w2/b2
        pl.BlockSpec((1, 1, E), lyr), pl.BlockSpec((1, 1, E), lyr),           # ln1
        pl.BlockSpec((1, 1, E), lyr), pl.BlockSpec((1, 1, E), lyr),           # ln2
        pl.BlockSpec((1, E), cst), pl.BlockSpec((1, E), cst),                 # enc_norm
    ]
    w_bytes = sum(_nbytes(enc[k]) for k in ('wqkv', 'wo', 'w1', 'w2'))
    cost = pl.CostEstimate(
        flops=int(nl * (2 * M * E * (4 * E + 2 * dff) + 4 * M * M * E)),
        transcendentals=int(nl * H * M * M),
        bytes_accessed=int(w_bytes + 2 * M * E * 4))
    return pl.pallas_call(
        functools.partial(_enc_stack_kernel, B=B, L=L, H=H, Dh=Dh, eps=eps),
        out_shape=jax.ShapeDtypeStruct((M, E), jnp.float32),
        grid_spec=pltpu.PrefetchScalarGridSpec(
            num_scalar_prefetch=0, grid=(nl,),
            in_specs=in_specs,
            out_specs=pl.BlockSpec((M, E), cst),
            scratch_shapes=[pltpu.VMEM((M, E), jnp.float32),   # residual carry
                            pltpu.VMEM((M, E), jnp.float32)]), # per-head attn assembly
        compiler_params=pltpu.CompilerParams(
            dimension_semantics=("arbitrary",),
            vmem_limit_bytes=_VMEM_LIMIT),
        cost_estimate=cost,
    )(x, enc['wqkv'], enc['bqkv'], enc['wo'], enc['bo'],
      enc['w1'], enc['b1'], enc['w2'], enc['b2'],
      enc['g1'], enc['n1'], enc['g2'], enc['n2'],
      enc_norm['g'], enc_norm['b'])


# ---------------------------------------------------------------------------
# Fused decoder stack: one pallas_call, grid = (num_layers,), weights streamed.
# ---------------------------------------------------------------------------
def _dec_stack_kernel(tgt_ref, mem_ref,
                      wqkv_ref, bqkv_ref, wos_ref, bos_ref,
                      wq_ref, bq_ref, wkv_ref, bkv_ref, wox_ref, box_ref,
                      w1_ref, b1_ref, w2_ref, b2_ref,
                      g1_ref, n1_ref, g2_ref, n2_ref, g3_ref, n3_ref,
                      out_ref, res_ref, att_ref, *, B, T, S, H, Dh, eps):
    lyr = pl.program_id(0)
    E = H * Dh
    Mq = B * T
    Mk = B * S

    @pl.when(lyr == 0)
    def _():
        res_ref[...] = tgt_ref[...]

    x = res_ref[...]
    mem = mem_ref[...]                       # encoder memory, already enc_norm'ed
    bias_s = _block_diag_bias(Mq, Mq, T, T)
    bias_x = _block_diag_bias(Mq, Mk, T, S)

    # --- self-attention (pre-norm; no causal mask, matching GILL's usage) ---
    xn = _ln_f32(x, g1_ref[0], n1_ref[0], eps)
    qkv = _mm_bf16(xn, wqkv_ref[0], bqkv_ref[0])
    qp, kp, vp = qkv[:, :E], qkv[:, E:2 * E], qkv[:, 2 * E:]
    for h in range(H):
        c = slice(h * Dh, (h + 1) * Dh)
        att_ref[:, c] = _head_attn(qp[:, c], kp[:, c], vp[:, c], bias_s)
    x = x + _mm_bf16(att_ref[...], wos_ref[0], bos_ref[0])

    # --- cross-attention over encoder memory (scale folded into wq at init) ---
    xn = _ln_f32(x, g2_ref[0], n2_ref[0], eps)
    q = _mm_bf16(xn, wq_ref[0], bq_ref[0])            # (Mq, E)
    kv = _mm_bf16(mem, wkv_ref[0], bkv_ref[0])        # (Mk, 2E)
    kp, vp = kv[:, :E], kv[:, E:]
    for h in range(H):
        c = slice(h * Dh, (h + 1) * Dh)
        att_ref[:, c] = _head_attn(q[:, c], kp[:, c], vp[:, c], bias_x)
    x = x + _mm_bf16(att_ref[...], wox_ref[0], box_ref[0])

    # --- feed-forward ---
    xn = _ln_f32(x, g3_ref[0], n3_ref[0], eps)
    ff = jnp.maximum(_mm_bf16(xn, w1_ref[0], b1_ref[0]), 0.0)
    x = x + _mm_bf16(ff, w2_ref[0], b2_ref[0])

    res_ref[...] = x
    out_ref[...] = x.astype(out_ref.dtype)   # only the last grid step's value persists


def decoder_stack_pallas(tgt, mem, dec, *, B, T, S, H, eps=_LN_EPS):
    Mq, E = tgt.shape
    Mk = mem.shape[0]
    nl = dec['wqkv'].shape[0]
    dff = dec['w1'].shape[-1]
    Dh = E // H
    lyr = lambda l: (l, 0, 0)
    cst = lambda l: (0, 0)
    in_specs = [
        pl.BlockSpec((Mq, E), cst),                                    # tgt (resident)
        pl.BlockSpec((Mk, E), cst),                                    # memory (resident)
        pl.BlockSpec((1, E, 3 * E), lyr), pl.BlockSpec((1, 1, 3 * E), lyr),   # self qkv
        pl.BlockSpec((1, E, E), lyr), pl.BlockSpec((1, 1, E), lyr),           # self out
        pl.BlockSpec((1, E, E), lyr), pl.BlockSpec((1, 1, E), lyr),           # cross q
        pl.BlockSpec((1, E, 2 * E), lyr), pl.BlockSpec((1, 1, 2 * E), lyr),   # cross kv
        pl.BlockSpec((1, E, E), lyr), pl.BlockSpec((1, 1, E), lyr),           # cross out
        pl.BlockSpec((1, E, dff), lyr), pl.BlockSpec((1, 1, dff), lyr),       # w1/b1
        pl.BlockSpec((1, dff, E), lyr), pl.BlockSpec((1, 1, E), lyr),         # w2/b2
        pl.BlockSpec((1, 1, E), lyr), pl.BlockSpec((1, 1, E), lyr),           # ln1
        pl.BlockSpec((1, 1, E), lyr), pl.BlockSpec((1, 1, E), lyr),           # ln2
        pl.BlockSpec((1, 1, E), lyr), pl.BlockSpec((1, 1, E), lyr),           # ln3
    ]
    w_bytes = sum(_nbytes(dec[k]) for k in ('wqkv', 'wos', 'wq', 'wkv', 'wox', 'w1', 'w2'))
    cost = pl.CostEstimate(
        flops=int(nl * (2 * Mq * E * (6 * E + 2 * dff) + 4 * Mk * E * E
                        + 4 * Mq * (Mq + Mk) * E)),
        transcendentals=int(nl * H * (Mq * Mq + Mq * Mk)),
        bytes_accessed=int(w_bytes + (2 * Mq + Mk) * E * 4))
    return pl.pallas_call(
        functools.partial(_dec_stack_kernel, B=B, T=T, S=S, H=H, Dh=Dh, eps=eps),
        out_shape=jax.ShapeDtypeStruct((Mq, E), jnp.float32),
        grid_spec=pltpu.PrefetchScalarGridSpec(
            num_scalar_prefetch=0, grid=(nl,),
            in_specs=in_specs,
            out_specs=pl.BlockSpec((Mq, E), cst),
            scratch_shapes=[pltpu.VMEM((Mq, E), jnp.float32),   # residual carry
                            pltpu.VMEM((Mq, E), jnp.float32)]), # per-head attn assembly
        compiler_params=pltpu.CompilerParams(
            dimension_semantics=("arbitrary",),
            vmem_limit_bytes=_VMEM_LIMIT),
        cost_estimate=cost,
    )(tgt, mem, dec['wqkv'], dec['bqkv'], dec['wos'], dec['bos'],
      dec['wq'], dec['bq'], dec['wkv'], dec['bkv'], dec['wox'], dec['box'],
      dec['w1'], dec['b1'], dec['w2'], dec['b2'],
      dec['g1'], dec['n1'], dec['g2'], dec['n2'], dec['g3'], dec['n3'])


# ---------------------------------------------------------------------------
# Parameter init (deterministic, synthetic; kernel-ready layout: (K,N) bf16 weights,
# per-layer tensors stacked along a leading layer dim for weight streaming).
# ---------------------------------------------------------------------------
def _init_linear(key, in_d, out_d, scale=0.02):
    kw, kb = jax.random.split(key)
    w = scale * jax.random.normal(kw, (out_d, in_d), jnp.float32)   # PyTorch (out, in)
    b = scale * jax.random.normal(kb, (out_d,), jnp.float32)
    return w.T, b.reshape(1, out_d)                                 # (in, out), (1, out)


def _init_encoder_stack(key, n_layers, e, dff, nhead):
    qs = 1.0 / math.sqrt(e // nhead)          # fold 1/sqrt(Dh) into the Q projection
    acc = {k: [] for k in ('wqkv', 'bqkv', 'wo', 'bo', 'w1', 'b1', 'w2', 'b2',
                           'g1', 'n1', 'g2', 'n2')}
    for lk in jax.random.split(key, n_layers):
        k1, k2, k3, k4 = jax.random.split(lk, 4)
        wqkv, bqkv = _init_linear(k1, e, 3 * e)
        wqkv = wqkv.at[:, :e].multiply(qs)
        bqkv = bqkv.at[:, :e].multiply(qs)
        wo, bo = _init_linear(k2, e, e)
        w1, b1 = _init_linear(k3, e, dff)
        w2, b2 = _init_linear(k4, dff, e)
        vals = dict(wqkv=wqkv, bqkv=bqkv, wo=wo, bo=bo, w1=w1, b1=b1, w2=w2, b2=b2,
                    g1=jnp.ones((1, e), jnp.float32), n1=jnp.zeros((1, e), jnp.float32),
                    g2=jnp.ones((1, e), jnp.float32), n2=jnp.zeros((1, e), jnp.float32))
        for k, v in vals.items():
            acc[k].append(v)
    out = {k: jnp.stack(v) for k, v in acc.items()}
    for k in ('wqkv', 'wo', 'w1', 'w2'):
        out[k] = out[k].astype(jnp.bfloat16)
    return out


def _init_decoder_stack(key, n_layers, e, dff, nhead):
    qs = 1.0 / math.sqrt(e // nhead)
    names = ('wqkv', 'bqkv', 'wos', 'bos', 'wq', 'bq', 'wkv', 'bkv', 'wox', 'box',
             'w1', 'b1', 'w2', 'b2', 'g1', 'n1', 'g2', 'n2', 'g3', 'n3')
    acc = {k: [] for k in names}
    for lk in jax.random.split(key, n_layers):
        k1, k2, k3, k4, k5, k6 = jax.random.split(lk, 6)
        wqkv, bqkv = _init_linear(k1, e, 3 * e)
        wqkv = wqkv.at[:, :e].multiply(qs)
        bqkv = bqkv.at[:, :e].multiply(qs)
        wos, bos = _init_linear(k2, e, e)
        wx, bx = _init_linear(k3, e, 3 * e)                 # cross-attn in_proj
        wq, bq = wx[:, :e] * qs, bx[:, :e] * qs
        wkv, bkv = wx[:, e:], bx[:, e:]
        wox, box = _init_linear(k4, e, e)
        w1, b1 = _init_linear(k5, e, dff)
        w2, b2 = _init_linear(k6, dff, e)
        vals = dict(wqkv=wqkv, bqkv=bqkv, wos=wos, bos=bos, wq=wq, bq=bq,
                    wkv=wkv, bkv=bkv, wox=wox, box=box, w1=w1, b1=b1, w2=w2, b2=b2,
                    g1=jnp.ones((1, e), jnp.float32), n1=jnp.zeros((1, e), jnp.float32),
                    g2=jnp.ones((1, e), jnp.float32), n2=jnp.zeros((1, e), jnp.float32),
                    g3=jnp.ones((1, e), jnp.float32), n3=jnp.zeros((1, e), jnp.float32))
        for k, v in vals.items():
            acc[k].append(v)
    out = {k: jnp.stack(v) for k, v in acc.items()}
    for k in ('wqkv', 'wos', 'wq', 'wkv', 'wox', 'w1', 'w2'):
        out[k] = out[k].astype(jnp.bfloat16)
    return out


# ---------------------------------------------------------------------------
# Forward passes
# ---------------------------------------------------------------------------
def _gill_forward(params, x, input_embs, *, nhead):
    B, L, _ = x.shape
    T = params['query_embs'].shape[1]
    E = params['query_embs'].shape[2]

    # fc with the residual add fused in (x + input_embs) @ Wfc + bfc
    h = add_linear_pallas(x.reshape(B * L, -1), input_embs.reshape(B * L, -1),
                          params['fc']['w'], params['fc']['b'])           # (B*L, E)

    # whole encoder stack (emits enc_norm'ed memory)
    mem = encoder_stack_pallas(h, params['enc'], params['enc_norm'], B=B, L=L, H=nhead)

    # whole decoder stack
    tgt0 = jnp.tile(params['query_embs'], (B, 1, 1)).reshape(B * T, E)
    dec = decoder_stack_pallas(tgt0, mem, params['dec'], B=B, T=T, S=L, H=nhead)

    # dec_norm fused as LN prologue of the output projection
    y = ln_linear_pallas(dec, params['dec_norm']['g'], params['dec_norm']['b'],
                         params['model']['w'], params['model']['b'])
    return y.reshape(B, T, -1)


def _linear_forward(params, x, input_embs):
    del input_embs
    B, L, _ = x.shape
    y = linear_pallas(x.reshape(B * L, -1), params['model']['w'], params['model']['b'])
    return y.reshape(B, L, -1)


# ---------------------------------------------------------------------------
# Pure-JAX (non-Pallas) reference with identical math / casts, for parity checks.
# ---------------------------------------------------------------------------
def _ref_gill_forward(params, x, input_embs, *, nhead):
    B, L, _ = x.shape
    E = params['fc']['w'].shape[1]
    H, Dh = nhead, E // nhead
    T = params['query_embs'].shape[1]
    M, Mq = B * L, B * T

    def attn_block(qp, kp, vp, bias):
        return jnp.concatenate(
            [_head_attn(qp[:, h * Dh:(h + 1) * Dh], kp[:, h * Dh:(h + 1) * Dh],
                        vp[:, h * Dh:(h + 1) * Dh], bias) for h in range(H)], axis=-1)

    xx = _mm_bf16((x + input_embs).reshape(B * L, -1), params['fc']['w'], params['fc']['b'])

    enc = params['enc']
    bias_e = _block_diag_bias(M, M, L, L)
    for i in range(enc['wqkv'].shape[0]):
        xn = _ln_f32(xx, enc['g1'][i], enc['n1'][i], _LN_EPS)
        qkv = _mm_bf16(xn, enc['wqkv'][i], enc['bqkv'][i])
        a = attn_block(qkv[:, :E], qkv[:, E:2 * E], qkv[:, 2 * E:], bias_e)
        xx = xx + _mm_bf16(a, enc['wo'][i], enc['bo'][i])
        xn = _ln_f32(xx, enc['g2'][i], enc['n2'][i], _LN_EPS)
        ff = jnp.maximum(_mm_bf16(xn, enc['w1'][i], enc['b1'][i]), 0.0)
        xx = xx + _mm_bf16(ff, enc['w2'][i], enc['b2'][i])
    mem = _ln_f32(xx, params['enc_norm']['g'], params['enc_norm']['b'], _LN_EPS)

    dec = params['dec']
    y = jnp.tile(params['query_embs'], (B, 1, 1)).reshape(Mq, E)
    bias_s = _block_diag_bias(Mq, Mq, T, T)
    bias_x = _block_diag_bias(Mq, M, T, L)
    for i in range(dec['wqkv'].shape[0]):
        xn = _ln_f32(y, dec['g1'][i], dec['n1'][i], _LN_EPS)
        qkv = _mm_bf16(xn, dec['wqkv'][i], dec['bqkv'][i])
        a = attn_block(qkv[:, :E], qkv[:, E:2 * E], qkv[:, 2 * E:], bias_s)
        y = y + _mm_bf16(a, dec['wos'][i], dec['bos'][i])
        xn = _ln_f32(y, dec['g2'][i], dec['n2'][i], _LN_EPS)
        qp = _mm_bf16(xn, dec['wq'][i], dec['bq'][i])
        kv = _mm_bf16(mem, dec['wkv'][i], dec['bkv'][i])
        a = attn_block(qp, kv[:, :E], kv[:, E:], bias_x)
        y = y + _mm_bf16(a, dec['wox'][i], dec['box'][i])
        xn = _ln_f32(y, dec['g3'][i], dec['n3'][i], _LN_EPS)
        ff = jnp.maximum(_mm_bf16(xn, dec['w1'][i], dec['b1'][i]), 0.0)
        y = y + _mm_bf16(ff, dec['w2'][i], dec['b2'][i])

    yn = _ln_f32(y, params['dec_norm']['g'], params['dec_norm']['b'], _LN_EPS)
    out = _mm_bf16(yn, params['model']['w'], params['model']['b'])
    return out.reshape(B, T, -1)


# ---------------------------------------------------------------------------
# TextFcLayer
# ---------------------------------------------------------------------------
class TextFcLayerPallas:
    HIDDEN = 512
    NHEAD = 4
    NUM_LAYERS = 4

    def __init__(self, in_dim, out_dim, num_input_tokens=1, num_output_tokens=1,
                 mode='linear', key=None):
        self.num_input_tokens = num_input_tokens
        self.num_output_tokens = num_output_tokens
        self.mode = mode
        if key is None:
            key = jax.random.PRNGKey(0)
        if mode == 'linear':
            w, b = _init_linear(key, in_dim, out_dim)
            self.params = {'model': {'w': w.astype(jnp.bfloat16), 'b': b}}
            self._fwd = jax.jit(_linear_forward)
        elif mode == 'gill_mapper':
            E, dff = self.HIDDEN, 4 * self.HIDDEN
            keys = jax.random.split(key, 5)
            fcw, fcb = _init_linear(keys[0], in_dim, E)
            mw, mb = _init_linear(keys[1], E, out_dim)
            self.params = {
                'fc': {'w': fcw.astype(jnp.bfloat16), 'b': fcb},
                'model': {'w': mw.astype(jnp.bfloat16), 'b': mb},
                'query_embs': jax.random.normal(keys[2], (1, num_output_tokens, E),
                                                jnp.float32),
                'enc': _init_encoder_stack(keys[3], self.NUM_LAYERS, E, dff, self.NHEAD),
                'dec': _init_decoder_stack(keys[4], self.NUM_LAYERS, E, dff, self.NHEAD),
                'enc_norm': {'g': jnp.ones((1, E), jnp.float32),
                             'b': jnp.zeros((1, E), jnp.float32)},
                'dec_norm': {'g': jnp.ones((1, E), jnp.float32),
                             'b': jnp.zeros((1, E), jnp.float32)},
            }
            self._fwd = jax.jit(functools.partial(_gill_forward, nhead=self.NHEAD))
        else:
            raise NotImplementedError(mode)

    def __call__(self, x, input_embs):
        outputs = self._fwd(self.params, x, input_embs)
        if self.mode == 'linear' and outputs.shape[1] != self.num_output_tokens:
            outputs = outputs[:, :self.num_output_tokens, :]
        assert outputs.shape[1] == 1 or \
            outputs.shape[1] * outputs.shape[2] == self.num_output_tokens * 768, \
            (outputs.shape, self.num_output_tokens)
        return outputs


# ---------------------------------------------------------------------------
if __name__ == "__main__":
    key = jax.random.PRNGKey(0)
    kx, ke, kp_lin, kp_gill = jax.random.split(key, 4)

    B, seq, in_dim, out_dim = 2, 8, 64, 768
    n_out = 4

    x = jax.random.normal(kx, (B, seq, in_dim), jnp.float32)
    input_embs = jax.random.normal(ke, (B, seq, in_dim), jnp.float32)

    # ---- mode='linear' ----
    lin_layer = TextFcLayerPallas(in_dim, out_dim, num_input_tokens=seq,
                                  num_output_tokens=n_out, mode='linear', key=kp_lin)
    out_lin = jax.block_until_ready(lin_layer(x, input_embs))
    assert out_lin.shape == (B, n_out, out_dim), out_lin.shape
    assert bool(jnp.all(jnp.isfinite(out_lin)))
    wm = lin_layer.params['model']
    ref_lin = _mm_bf16(x.reshape(B * seq, in_dim), wm['w'],
                       wm['b']).reshape(B, seq, out_dim)[:, :n_out]
    err_lin = float(jnp.max(jnp.abs(out_lin - ref_lin)))
    assert err_lin < 1e-2, ("linear parity", err_lin)

    # ---- mode='gill_mapper' ----
    gill_layer = TextFcLayerPallas(in_dim, out_dim, num_input_tokens=seq,
                                   num_output_tokens=n_out, mode='gill_mapper', key=kp_gill)
    out_gill = jax.block_until_ready(gill_layer(x, input_embs))
    assert out_gill.shape == (B, n_out, out_dim), out_gill.shape
    assert bool(jnp.all(jnp.isfinite(out_gill)))
    ref_gill = _ref_gill_forward(gill_layer.params, x, input_embs,
                                 nhead=TextFcLayerPallas.NHEAD)
    err_gill = float(jnp.max(jnp.abs(out_gill - ref_gill)))
    assert err_gill < 2e-2, ("gill_mapper parity", err_gill)

    print("KERNEL_OK")
</pallas_src>

<mosaic_0001>
module attributes {stable_mosaic.version = 11 : i64} {
  func.func @_linear_kernel(%arg0: i32, %arg1: memref<16x64xf32, #tpu.memory_space<vmem>>, %arg2: memref<64x768xbf16, #tpu.memory_space<vmem>>, %arg3: memref<1x768xf32, #tpu.memory_space<vmem>>, %arg4: memref<16x768xf32, #tpu.memory_space<vmem>>) attributes {dimension_semantics = [#tpu.dimension_semantics<arbitrary>], iteration_bounds = array<i64: 1>, scalar_prefetch = 0 : i64, scratch_operands = 0 : i64, tpu.core_type = #tpu.core_type<tc>, window_params = [{pipeline_mode = #tpu.pipeline_mode<synchronous>, transform_indices = @transform_0, window_bounds = array<i64: 16, 64>}, {pipeline_mode = #tpu.pipeline_mode<synchronous>, transform_indices = @transform_1, window_bounds = array<i64: 64, 768>}, {pipeline_mode = #tpu.pipeline_mode<synchronous>, transform_indices = @transform_2, window_bounds = array<i64: 1, 768>}, {pipeline_mode = #tpu.pipeline_mode<synchronous>, transform_indices = @transform_3, window_bounds = array<i64: 16, 768>}]} {
    %c0 = arith.constant 0 : index
    %c0_0 = arith.constant 0 : index
    %0 = vector.load %arg1[%c0, %c0_0] : memref<16x64xf32, #tpu.memory_space<vmem>>, vector<16x64xf32>
    %c0_1 = arith.constant 0 : index
    %c0_2 = arith.constant 0 : index
    %1 = vector.load %arg2[%c0_1, %c0_2] : memref<64x768xbf16, #tpu.memory_space<vmem>>, vector<64x768xbf16>
    %c0_3 = arith.constant 0 : index
    %c0_4 = arith.constant 0 : index
    %2 = vector.load %arg3[%c0_3, %c0_4] : memref<1x768xf32, #tpu.memory_space<vmem>>, vector<1x768xf32>
    %3 = arith.truncf %0 : vector<16x64xf32> to vector<16x64xbf16>
    %cst = arith.constant dense<0.000000e+00> : vector<16x768xf32>
    %4 = tpu.matmul %3, %1, %cst {dimension_numbers = #tpu.dot_dimension_numbers<[1], [0], [0], [1], [0, 0, 1, 1], [], []>} : vector<16x64xbf16>, vector<64x768xbf16>, vector<16x768xf32> -> vector<16x768xf32>
    %5 = vector.broadcast %2 : vector<1x768xf32> to vector<16x768xf32>
    %6 = arith.addf %4, %5 : vector<16x768xf32>
    %c0_5 = arith.constant 0 : index
    %c0_6 = arith.constant 0 : index
    %7 = vector.load %arg4[%c0_5, %c0_6] : memref<16x768xf32, #tpu.memory_space<vmem>>, vector<16x768xf32>
    tpu.vector_store %arg4[%c0_5, %c0_6], %6 {strides = array<i32>} : memref<16x768xf32, #tpu.memory_space<vmem>>, vector<16x768xf32>,
    return
  }
  func.func @transform_0(%arg0: i32) -> (i32, i32) {
    %c0_i32 = arith.constant 0 : i32
    %c0_i32_0 = arith.constant 0 : i32
    %c0_i32_1 = arith.constant 0 : i32
    return %c0_i32, %c0_i32_0 : i32, i32
  }
  func.func @transform_1(%arg0: i32) -> (i32, i32) {
    %c0_i32 = arith.constant 0 : i32
    %c0_i32_0 = arith.constant 0 : i32
    %c0_i32_1 = arith.constant 0 : i32
    return %c0_i32, %c0_i32_0 : i32, i32
  }
  func.func @transform_2(%arg0: i32) -> (i32, i32) {
    %c0_i32 = arith.constant 0 : i32
    %c0_i32_0 = arith.constant 0 : i32
    %c0_i32_1 = arith.constant 0 : i32
    return %c0_i32, %c0_i32_0 : i32, i32
  }
  func.func @transform_3(%arg0: i32) -> (i32, i32) {
    %c0_i32 = arith.constant 0 : i32
    %c0_i32_0 = arith.constant 0 : i32
    %c0_i32_1 = arith.constant 0 : i32
    return %c0_i32, %c0_i32_0 : i32, i32
  }
}

</mosaic_0001>

<bundles_post_ra>
// kernel: _linear_forward.1
= control target key start
LH: loop header
LB: loop body
LE: loop exit
PB: predicated region body
PF: predicated region fallthrough
CT: control target
= control target key end

     0   :  { %8 = vsyncpa [#allocation3], 0  ;;  %s603_s0 = inlined_call_operand.hbm [shape: f32[16,64], index: 0, kind: input, shape index: {}]   ;;  %s604_s1 = inlined_call_operand.hbm [shape: bf16[64,768], index: 1, kind: input, shape index: {}]   ;;  %s605_s2 = inlined_call_operand.hbm [shape: f32[1,768], index: 2, kind: input, shape index: {}]   ;;  %s606_s3 = inlined_call_operand.hbm [shape: f32[16,768], index: 3, kind: output, shape index: {}]  }
   0x1   :  { %9 = vsyncpa [#allocation6], 0 }
   0x2   :  { %10 = vsyncpa [#allocation4], 0  ;;  %s557_s12 = smov [#allocation5]  }
   0x3   :  { %s28_s13 = sshll.u32 %s557_s12, 4  ;;  %s29_s13 = int_to_ptr.vmem [resolvable:$true] %s28_s13 }
   0x4   :  { %s479_s14 = scalar_lea.vmem %s29_s13, 3072  ;;  %p484_p1 = scmp.lt.s32.totalorder %s29_s13, %s29_s13 }
   0x5   :  { %p480_p0 = scmp.ne.s32.totalorder %s29_s13, %s479_s14  ;;  %p485_p2 = scmp.lt.s32.totalorder %s479_s14, %s479_s14 }
   0x7   :  { %p486_p3 = por %p485_p2, %p484_p1 }
   0x9   :  { %p487_p4 = pnand %p486_p3, %p480_p0 }
   0xb   :  { %490 = shalt.err (!%p487_p4)
}
   0xc   :  { %s558_s15 = smov 384   ;;  %s559_s16 = smov 24  }
   0xd   :  { %34 = dma.hbm_to_vmem [thread:$0]  %s604_s1, 3072, %s29_s13, [#allocation6], %s558_s15, %s558_s15, %s559_s16  }
   0xe   :  { %s560_s19 = smov [#allocation2]  }
   0xf   :  { %s16_s20 = sshll.u32 %s560_s19, 4  ;;  %s17_s20 = int_to_ptr.vmem [resolvable:$true] %s16_s20 }
  0x10   :  { %s499_s21 = scalar_lea.vmem %s17_s20, 256  ;;  %p504_p6 = scmp.lt.s32.totalorder %s17_s20, %s17_s20 }
  0x11   :  { %p500_p5 = scmp.ne.s32.totalorder %s17_s20, %s499_s21  ;;  %p505_p7 = scmp.lt.s32.totalorder %s499_s21, %s499_s21 }
  0x13   :  { %p506_p8 = por %p505_p7, %p504_p6 }
  0x15   :  { %p507_p9 = pnand %p506_p8, %p500_p5 }
  0x17   :  { %510 = shalt.err (!%p507_p9)
}
  0x18   :  { %s561_s22 = smov 128   ;;  %s562_s23 = smov 8  }
  0x19   :  { %22 = dma.hbm_to_vmem [thread:$0]  %s603_s0, 256, %s17_s20, [#allocation3], %s561_s22, %s561_s22, %s562_s23  }
  0x1a   :  { %s563_s26 = smov [#allocation7]  }
  0x1b   :  { %s41_s27 = sshll.u32 %s563_s26, 4  ;;  %s42_s27 = int_to_ptr.vmem [resolvable:$true] %s41_s27 }
  0x1c   :  { %s519_s1 = scalar_lea.vmem %s42_s27, 96  ;;  %p524_p11 = scmp.lt.s32.totalorder %s42_s27, %s42_s27 }
  0x1d   :  { %p520_p10 = scmp.ne.s32.totalorder %s42_s27, %s519_s1  ;;  %p525_p12 = scmp.lt.s32.totalorder %s519_s1, %s519_s1 }
  0x1f   :  { %p526_p13 = por %p525_p12, %p524_p11 }
  0x21   :  { %p527_p0 = pnand %p526_p13, %p520_p10 }
  0x23   :  { %530 = shalt.err (!%p527_p0)
}
  0x24   :  { %44 = dma.hbm_to_vmem [thread:$0]  %s605_s2, 96, %s42_s27, [#allocation6]  }
  0x25   :  { %551 = dma.done.wait [#allocation3], 256  }
  0x26   :  { %552 = vsyncadd [#allocation3], 4294967040 }
  0x27   :  { %553 = dma.done.wait [#allocation6], 3168  }
  0x28   :  { %554 = vsyncadd [#allocation6], 4294964128  ;;  %v564_v0 = vmov 0   ;;  %v435_v1 = vld [vmem:[#allocation5 + $0x94] ss:$24 sps:$4 sm:$0xff]   ;;  %v56_v14 = vld [vmem:[#allocation2 + $0x8] sm:$0xff]  ;;  %v84_v28 = vlaneseq }
  0x29   :  { %270 = vmatprep.mubr.bf16.mxu0 %v564_v0  ;;  %313 = vmatprep.mubr.bf16.mxu1 %v564_v0  ;;  %v437_v2 = vld [vmem:[#allocation5 + $0x90] ss:$24 sps:$4 sm:$0xff]   ;;  %v438_v3 = vld [vmem:[#allocation5 + $0x64] ss:$24 sps:$4 sm:$0xff]   ;;  %v440_v4 = vld [vmem:[#allocation5 + $0x60] ss:$24 sps:$4 sm:$0xff]  }
  0x2a   :  { %246 = vmatprep.subr.bf16.mxu0 %v435_v1  ;;  %v441_v5 = vld [vmem:[#allocation5 + $0x34] ss:$24 sps:$4 sm:$0xff]   ;;  %v446_v7 = vld [vmem:[#allocation5 + $0x98] ss:$24 sps:$4 sm:$0xff]   ;;  %v452_v10 = vld [vmem:[#allocation5 + $0x68] ss:$24 sps:$4 sm:$0xff]  }
  0x2b   :  { %247 = vmatpush1.bf16.msra.mxu0 %v437_v2  ;;  %v444_v6 = vld [vmem:[#allocation5 + $0x9c] ss:$24 sps:$4 sm:$0xff]   ;;  %v443_v8 = vld [vmem:[#allocation5 + $0x30] ss:$24 sps:$4 sm:$0xff]   ;;  %v450_v9 = vld [vmem:[#allocation5 + $0x6c] ss:$24 sps:$4 sm:$0xff]  }
  0x2c   :  { %248 = vmatprep.subr.bf16.mxu0 %v438_v3  ;;  %289 = vmatprep.subr.bf16.mxu1 %v444_v6  ;;  %v447_v11 = vld [vmem:[#allocation5 + $0x4] ss:$24 sps:$4 sm:$0xff]   ;;  %v449_v12 = vld [vmem:[#allocation5] ss:$24 sps:$4 sm:$0xff]   ;;  %v55_v13 = vld [vmem:[#allocation2] sm:$0xff]  ;;  %vm234_vm0 = vcmask 523264  }
  0x2d   :  { %290 = vmatpush1.bf16.msra.mxu1 %v446_v7  ;;  %v456_v15 = vld [vmem:[#allocation5 + $0x3c] ss:$24 sps:$4 sm:$0xff]   ;;  %v458_v16 = vld [vmem:[#allocation5 + $0x38] ss:$24 sps:$4 sm:$0xff]   ;;  %v462_v18 = vld [vmem:[#allocation5 + $0xc] ss:$24 sps:$4 sm:$0xff]   ;;  %v82_v19 = vpack.c.bf16 %v56_v14, %v55_v13 }
  0x2e   :  { %291 = vmatprep.subr.bf16.mxu1 %v450_v9  ;;  %v455_v17 = vld [vmem:[#allocation5 + $0xa4] ss:$24 sps:$4 sm:$0xff]   ;;  %v453_v20 = vld [vmem:[#allocation5 + $0xa0] ss:$24 sps:$4 sm:$0xff]   ;;  %v461_v22 = vld [vmem:[#allocation5 + $0x74] ss:$24 sps:$4 sm:$0xff]  }
  0x2f   :  { %249 = vmatpush1.bf16.msra.mxu0 %v440_v4  ;;  %v464_v21 = vld [vmem:[#allocation5 + $0x8] ss:$24 sps:$4 sm:$0xff]   ;;  %v467_v24 = vld [vmem:[#allocation5 + $0x44] ss:$24 sps:$4 sm:$0xff]   ;;  %v470_v26 = vld [vmem:[#allocation5 + $0x14] ss:$24 sps:$4 sm:$0xff]  }
  0x30   :  { %250 = vmatprep.subr.bf16.mxu0 %v441_v5  ;;  %v459_v23 = vld [vmem:[#allocation5 + $0x70] ss:$24 sps:$4 sm:$0xff]   ;;  %v465_v25 = vld [vmem:[#allocation5 + $0x40] ss:$24 sps:$4 sm:$0xff]   ;;  %v85_v29 = vshrl.u32 %v84_v28, 7  ;;  %s565_s0 = smov [#allocation8]  }
  0x31   :  { %292 = vmatpush1.bf16.msra.mxu1 %v452_v10  ;;  %v468_v27 = vld [vmem:[#allocation5 + $0x10] ss:$24 sps:$4 sm:$0xff]   ;;  %v81_v31 = vld [vmem:[#allocation7] sm:$0x3f]  ;;  %s384_s2 = sshll.u32 %s565_s0, 4  ;;  %s385_s2 = int_to_ptr.vmem [resolvable:$true] %s384_s2 }
  0x32   :  { %293 = vmatprep.subr.bf16.mxu1 %v456_v15  ;;  %v86_v30 = vsub.s32 0, %v85_v29  ;;  %v90_v32 = vsub.s32 1, %v85_v29  ;;  %v94_v34 = vsub.s32 2, %v85_v29  ;;  %v98_v36 = vsub.s32 3, %v85_v29  ;;  %s531_s30 = scalar_lea.vmem %s385_s2, 1536  ;;  %p536_p2 = scmp.lt.s32.totalorder %s385_s2, %s385_s2 }
  0x33   :  { %251 = vmatpush1.bf16.msra.mxu0 %v443_v8  ;;  %v102_v53 = vsub.s32 4, %v85_v29  ;;  %v106_v56 = vsub.s32 5, %v85_v29  ;;  %p532_p1 = scmp.ne.s32.totalorder %s385_s2, %s531_s30  ;;  %p537_p3 = scmp.lt.s32.totalorder %s531_s30, %s531_s30 }
  0x34   :  { %252 = vmatprep.subr.bf16.mxu0 %v447_v11  ;;  %v87_v33 = vrot.slane %v81_v31, %v86_v30  ;;  %v91_v35 = vrot.slane %v81_v31, %v90_v32  ;;  %v95_v39 = vrot.slane %v81_v31, %v94_v34  ;;  %v99_v42 = vrot.slane %v81_v31, %v98_v36 }
  0x35   :  { %294 = vmatpush1.bf16.msra.mxu1 %v458_v16  ;;  %v103_v57 = vrot.slane %v81_v31, %v102_v53  ;;  %v107_v58 = vrot.slane %v81_v31, %v106_v56  ;;  %p538_p4 = por %p537_p3, %p536_p2 }
  0x36   :  { %295 = vmatprep.subr.bf16.mxu1 %v462_v18 }
  0x37   :  { %253 = vmatpush1.bf16.msra.mxu0 %v449_v12  ;;  %p539_p5 = pnand %p538_p4, %p532_p1 }
  0x38   :  { %332 = vmatprep.subr.bf16.mxu0 %v455_v17 }
  0x39   :  { %296 = vmatpush1.bf16.msra.mxu1 %v464_v21 }
  0x3a   :  { %421 = vmatmul.mubr.msk.bf16.vlgmr.msra.gmra.mxu0 %vm234_vm0, %v82_v19 }
  0x3b   :  { %333 = vmatpush1.bf16.msra.mxu0 %v453_v20  ;;  %356 = vmatprep.mubr.bf16.mxu0 %v564_v0 }
  0x3c   :  { %334 = vmatprep.subr.bf16.mxu0 %v461_v22  ;;  %422 = vmatmul.mubr.msk.bf16.vlgmr.msra.gmra.mxu1 %vm234_vm0, %v82_v19 }
  0x3f   :  { %335 = vmatpush1.bf16.msra.mxu0 %v459_v23 }
  0x40   :  { %336 = vmatprep.subr.bf16.mxu0 %v467_v24 }
  0x43   :  { %337 = vmatpush1.bf16.msra.mxu0 %v465_v25 }
  0x44   :  { %338 = vmatprep.subr.bf16.mxu0 %v470_v26 }
  0x47   :  { %339 = vmatpush1.bf16.msra.mxu0 %v468_v27 }
  0x4a   :  { %423 = vmatmul.mubr.msk.bf16.vlgmr.msra.gmra.mxu0 %vm234_vm0, %v82_v19 }
  0xfa   :  { %v272_v37 = vpop.f32.mrf.mxu0 }
  0xfb   :  { %v273_v38 = vadd.f32 %v272_v37, %v87_v33 }
  0xfc   :  { %v274_v40 = vpop.f32.mrf.mxu0  ;;  %v315_v44 = vpop.f32.mrf.mxu1 }
  0xfd   :  { %367 = vst [vmem:[#allocation8] sm:$0xff] %v273_v38  ;;  %v275_v41 = vadd.f32 %v274_v40, %v91_v35  ;;  %v316_v46 = vadd.f32 %v315_v44, %v95_v39 }
  0xfe   :  { %v276_v43 = vpop.f32.mrf.mxu0  ;;  %v317_v48 = vpop.f32.mrf.mxu1 }
  0xff   :  { %368 = vst [vmem:[#allocation8 + $0x8] sm:$0xff] %v275_v41  ;;  %v277_v45 = vadd.f32 %v276_v43, %v87_v33  ;;  %369 = vst [vmem:[#allocation8 + $0x10] sm:$0xff] %v316_v46  ;;  %v318_v50 = vadd.f32 %v317_v48, %v99_v42 }
 0x100   :  { %v278_v47 = vpop.f32.mrf.mxu0  ;;  %v319_v51 = vpop.f32.mrf.mxu1 }
 0x101   :  { %373 = vst [vmem:[#allocation8 + $0x30] sm:$0xff] %v277_v45  ;;  %v279_v49 = vadd.f32 %v278_v47, %v91_v35  ;;  %370 = vst [vmem:[#allocation8 + $0x18] sm:$0xff] %v318_v50  ;;  %v320_v52 = vadd.f32 %v319_v51, %v95_v39 }
 0x102   :  { %v321_v54 = vpop.f32.mrf.mxu1 }
 0x103   :  { %374 = vst [vmem:[#allocation8 + $0x38] sm:$0xff] %v279_v49  ;;  %375 = vst [vmem:[#allocation8 + $0x40] sm:$0xff] %v320_v52  ;;  %v322_v55 = vadd.f32 %v321_v54, %v99_v42 }
 0x105   :  { %376 = vst [vmem:[#allocation8 + $0x48] sm:$0xff] %v322_v55 }
 0x10a   :  { %v358_v59 = vpop.f32.mrf.mxu0 }
 0x10b   :  { %v359_v60 = vadd.f32 %v358_v59, %v103_v57 }
 0x10c   :  { %v360_v61 = vpop.f32.mrf.mxu0 }
 0x10d   :  { %371 = vst [vmem:[#allocation8 + $0x20] sm:$0xff] %v359_v60  ;;  %v361_v62 = vadd.f32 %v360_v61, %v107_v58 }
 0x10e   :  { %v362_v63 = vpop.f32.mrf.mxu0 }
 0x10f   :  { %372 = vst [vmem:[#allocation8 + $0x28] sm:$0xff] %v361_v62  ;;  %v363_v0 = vadd.f32 %v362_v63, %v103_v57 }
 0x110   :  { %v364_v1 = vpop.f32.mrf.mxu0 }
 0x111   :  { %377 = vst [vmem:[#allocation8 + $0x50] sm:$0xff] %v363_v0  ;;  %v365_v2 = vadd.f32 %v364_v1, %v107_v58 }
 0x113   :  { %378 = vst [vmem:[#allocation8 + $0x58] sm:$0xff] %v365_v2 }
 0x114   :  { %542 = shalt.err (!%p539_p5)
}
 0x115   :  { %s566_s4 = smov 768   ;;  %s567_s5 = smov 48  }
 0x116   :  { %390 = dma.vmem_to_hbm [thread:$0]  %s385_s2, 1536, %s606_s3, [#allocation4], %s566_s4, %s566_s4, %s567_s5  }
 0x117   :  { %555 = dma.done.wait [#allocation4], 1536  }
 0x118   :  { %556 = vsyncadd [#allocation4], 4294965760 }
 0x119   :  { %394 = vsyncpa [#allocation3], 1 }
 0x11a   :  { %395 = vsyncpa [#allocation6], 1 }
 0x11b   :  { %396 = vsyncpa [#allocation4], 1 }

</bundles_post_ra>
